<compile_context>
chip_gen: v7x
topology: tpu7x:2x2x1
jax: 0.10.0
libtpu: 0.0.40
codegen_flags: <defaults>
</compile_context>

<pallas_src>
import functools
import math

import jax
import jax.numpy as jnp
from jax.experimental import pallas as pl
from jax.experimental.pallas import tpu as pltpu


def _round_up(x, m):
    return (x + m - 1) // m * m


def prepare_aspp_params(w_oihw, gamma, beta, running_mean, running_var, eps=1e-5):
    """Fold eval-mode BN into the conv: returns bf16 HWIO weight + f32 bias."""
    scale = gamma / jnp.sqrt(running_var + eps)                      # (Cout,)
    bias = beta - running_mean * scale                               # (Cout,)
    w_hwio = jnp.transpose(w_oihw, (2, 3, 1, 0)) * scale[None, None, None, :]
    return w_hwio.astype(jnp.bfloat16), bias.astype(jnp.float32)


def aspp_forward(x_nchw, w_hwio, bias, *, padding, dilation):
    """_ASPPModule.forward: relu(bn(atrous_conv(x))), BN folded into (w, bias)."""
    N, Cin, H, W = x_nchw.shape
    kh, kw, cin_w, Cout = w_hwio.shape
    assert kh == kw and cin_w == Cin
    ks, dil, pad = kh, dilation, padding

    H_out = H + 2 * pad - dil * (ks - 1)
    W_out = W + 2 * pad - dil * (ks - 1)
    assert H_out >= 1 and W_out >= 1

    # Pad W_out to a sublane multiple so in-kernel collapses/stores stay aligned.
    W_out_p = _round_up(W_out, 8)
    Hp = H + 2 * pad
    Wp = W_out_p + dil * (ks - 1)                                    # >= W + 2*pad

    # Output-channel tile: 256 (v6e/v7x MXU width) when Cout allows, else 128.
    if Cout <= 128:
        Cout_p, tcout = 128, 128
    else:
        Cout_p, tcout = _round_up(Cout, 256), 256

    # One-time layout/dtype prep (single pass each; weights already bf16).
    x_nhwc = jnp.transpose(x_nchw, (0, 2, 3, 1)).astype(jnp.bfloat16)
    x_pad = jnp.pad(x_nhwc, ((0, 0),
                             (pad, Hp - H - pad),
                             (pad, Wp - W - pad),
                             (0, 0)))
    w_p = jnp.pad(w_hwio, ((0, 0), (0, 0), (0, 0), (0, Cout_p - Cout)))
    b_p = jnp.pad(bias, (0, Cout_p - Cout)).reshape(1, Cout_p)

    # In-kernel M (row) chunking keeps the f32 accumulator bounded (~1K rows).
    row_chunk = max(1, min(H_out, 1024 // W_out_p))
    acc_rows = row_chunk * W_out_p

    def kernel(x_ref, w_ref, b_ref, o_ref, acc_ref):
        bias_v = b_ref[...]                                          # (1, tcout) f32
        r0 = 0
        while r0 < H_out:                                            # static unroll
            th = min(row_chunk, H_out - r0)
            m = th * W_out_p
            first = True
            for ky in range(ks):
                for kx in range(ks):
                    xs = x_ref[0,
                               r0 + ky * dil: r0 + ky * dil + th,
                               kx * dil: kx * dil + W_out_p,
                               :]                                     # (th, W_out_p, Cin) bf16
                    contrib = jnp.dot(xs.reshape(m, Cin), w_ref[ky, kx],
                                      preferred_element_type=jnp.float32)
                    if first:
                        acc_ref[:m, :] = contrib
                        first = False
                    else:
                        acc_ref[:m, :] += contrib
            o_ref[0, r0 * W_out_p:(r0 + th) * W_out_p, :] = jnp.maximum(
                acc_ref[:m, :] + bias_v, 0.0).astype(o_ref.dtype)
            r0 += th

    # VMEM budget: double-buffered blocks + scratch, clamped to sane limits.
    x_blk = Hp * Wp * Cin * 2
    w_blk = ks * ks * Cin * tcout * 2
    o_blk = H_out * W_out_p * tcout * 4
    acc_blk = acc_rows * tcout * 4
    est = 2 * (x_blk + w_blk + o_blk) + acc_blk + (4 << 20)
    vmem_limit = int(min(100 * 1024 * 1024, max(32 * 1024 * 1024, est)))

    out = pl.pallas_call(
        kernel,
        out_shape=jax.ShapeDtypeStruct((N, H_out * W_out_p, Cout_p), jnp.float32),
        grid=(N, Cout_p // tcout),
        in_specs=[
            pl.BlockSpec((1, Hp, Wp, Cin), lambda n, j: (n, 0, 0, 0)),
            pl.BlockSpec((ks, ks, Cin, tcout), lambda n, j: (0, 0, 0, j)),
            pl.BlockSpec((1, tcout), lambda n, j: (0, j)),
        ],
        out_specs=pl.BlockSpec((1, H_out * W_out_p, tcout), lambda n, j: (n, 0, j)),
        scratch_shapes=[pltpu.VMEM((acc_rows, tcout), jnp.float32)],
        compiler_params=pltpu.CompilerParams(
            dimension_semantics=("parallel", "parallel"),
            vmem_limit_bytes=vmem_limit),
    )(x_pad, w_p, b_p)

    out = out.reshape(N, H_out, W_out_p, Cout_p)[:, :, :W_out, :Cout]
    return jnp.transpose(out, (0, 3, 1, 2))                          # back to NCHW


def aspp_reference(x_nchw, w_hwio, bias, *, padding, dilation):
    """Pure-JAX reference (same bf16-rounded operands, f32 accumulation)."""
    x = jnp.transpose(x_nchw, (0, 2, 3, 1)).astype(jnp.bfloat16).astype(jnp.float32)
    w = w_hwio.astype(jnp.float32)
    y = jax.lax.conv_general_dilated(
        x, w, window_strides=(1, 1),
        padding=[(padding, padding), (padding, padding)],
        rhs_dilation=(dilation, dilation),
        dimension_numbers=("NHWC", "HWIO", "NHWC"),
        precision=jax.lax.Precision.HIGHEST)
    y = jnp.maximum(y + bias[None, None, None, :], 0.0)
    return jnp.transpose(y, (0, 3, 1, 2))


if __name__ == "__main__":
    key = jax.random.PRNGKey(0)
    kx, kw_base = jax.random.split(key, 2)

    N, Cin, H, W = 2, 32, 16, 16
    planes = 256
    x = jax.random.normal(kx, (N, Cin, H, W), jnp.float32)

    # Eval-mode BatchNorm parameters (PyTorch defaults).
    gamma = jnp.ones((planes,), jnp.float32)
    beta = jnp.zeros((planes,), jnp.float32)
    rmean = jnp.zeros((planes,), jnp.float32)
    rvar = jnp.ones((planes,), jnp.float32)

    # The two ASPP branch flavours: 1x1 conv and a dilated 3x3 conv.
    configs = [(1, 0, 1), (3, 2, 2)]                                  # (ks, padding, dilation)
    for i, (ks, pad, dil) in enumerate(configs):
        kw = jax.random.fold_in(kw_base, i)
        std = math.sqrt(2.0 / (Cin * ks * ks))
        w = jax.random.normal(kw, (planes, Cin, ks, ks), jnp.float32) * std
        w_prep, b_prep = prepare_aspp_params(w, gamma, beta, rmean, rvar)

        fwd = jax.jit(functools.partial(aspp_forward, padding=pad, dilation=dil))
        out = fwd(x, w_prep, b_prep)
        jax.block_until_ready(out)
        assert out.shape == (N, planes, H, W), out.shape
        assert bool(jnp.all(jnp.isfinite(out)))

        ref = aspp_reference(x, w_prep, b_prep, padding=pad, dilation=dil)
        err = float(jnp.max(jnp.abs(out - ref)))
        assert err < 2e-2, err

    print("KERNEL_OK")
</pallas_src>

<mosaic_0001>
module attributes {stable_mosaic.version = 11 : i64} {
  func.func @kernel(%arg0: i32, %arg1: i32, %arg2: memref<1x16x16x32xbf16, #tpu.memory_space<vmem>>, %arg3: memref<1x1x32x256xbf16, #tpu.memory_space<vmem>>, %arg4: memref<1x256xf32, #tpu.memory_space<vmem>>, %arg5: memref<1x256x256xf32, #tpu.memory_space<vmem>>, %arg6: memref<256x256xf32, #tpu.memory_space<vmem>>) attributes {dimension_semantics = [#tpu.dimension_semantics<parallel>, #tpu.dimension_semantics<parallel>], iteration_bounds = array<i64: 2, 1>, scalar_prefetch = 0 : i64, scratch_operands = 1 : i64, tpu.core_type = #tpu.core_type<tc>, window_params = [{transform_indices = @transform_0, window_bounds = array<i64: 1, 16, 16, 32>}, {transform_indices = @transform_1, window_bounds = array<i64: 1, 1, 32, 256>}, {transform_indices = @transform_2, window_bounds = array<i64: 1, 256>}, {transform_indices = @transform_3, window_bounds = array<i64: 1, 256, 256>}]} {
    %c0 = arith.constant 0 : index
    %c0_0 = arith.constant 0 : index
    %0 = vector.load %arg4[%c0, %c0_0] : memref<1x256xf32, #tpu.memory_space<vmem>>, vector<1x256xf32>
    %c0_1 = arith.constant 0 : index
    %c0_2 = arith.constant 0 : index
    %c0_3 = arith.constant 0 : index
    %c0_4 = arith.constant 0 : index
    %1 = vector.load %arg2[%c0_1, %c0_2, %c0_3, %c0_4] : memref<1x16x16x32xbf16, #tpu.memory_space<vmem>>, vector<1x16x16x32xbf16>
    %2 = vector.shape_cast %1 : vector<1x16x16x32xbf16> to vector<16x16x32xbf16>
    %3 = vector.shape_cast %2 : vector<16x16x32xbf16> to vector<256x32xbf16>
    %c0_5 = arith.constant 0 : index
    %c0_6 = arith.constant 0 : index
    %c0_7 = arith.constant 0 : index
    %c0_8 = arith.constant 0 : index
    %4 = vector.load %arg3[%c0_5, %c0_6, %c0_7, %c0_8] : memref<1x1x32x256xbf16, #tpu.memory_space<vmem>>, vector<1x1x32x256xbf16>
    %5 = vector.shape_cast %4 : vector<1x1x32x256xbf16> to vector<32x256xbf16>
    %cst = arith.constant dense<0.000000e+00> : vector<256x256xf32>
    %6 = tpu.matmul %3, %5, %cst {dimension_numbers = #tpu.dot_dimension_numbers<[1], [0], [0], [1], [0, 0, 1, 1], [], []>} : vector<256x32xbf16>, vector<32x256xbf16>, vector<256x256xf32> -> vector<256x256xf32>
    %c0_9 = arith.constant 0 : index
    %c0_10 = arith.constant 0 : index
    %7 = vector.load %arg6[%c0_9, %c0_10] : memref<256x256xf32, #tpu.memory_space<vmem>>, vector<256x256xf32>
    tpu.vector_store %arg6[%c0_9, %c0_10], %6 {strides = array<i32>} : memref<256x256xf32, #tpu.memory_space<vmem>>, vector<256x256xf32>,
    %c0_11 = arith.constant 0 : index
    %c0_12 = arith.constant 0 : index
    %8 = vector.load %arg6[%c0_11, %c0_12] : memref<256x256xf32, #tpu.memory_space<vmem>>, vector<256x256xf32>
    %9 = vector.broadcast %0 : vector<1x256xf32> to vector<256x256xf32>
    %10 = arith.addf %8, %9 : vector<256x256xf32>
    %cst_13 = arith.constant 0.000000e+00 : f32
    %11 = vector.broadcast %cst_13 : f32 to vector<256x256xf32>
    %12 = arith.maximumf %10, %11 : vector<256x256xf32>
    %c0_14 = arith.constant 0 : index
    %c0_15 = arith.constant 0 : index
    %c0_16 = arith.constant 0 : index
    %13 = vector.load %arg5[%c0_14, %c0_15, %c0_16] : memref<1x256x256xf32, #tpu.memory_space<vmem>>, vector<1x256x256xf32>
    %14 = vector.shape_cast %13 : vector<1x256x256xf32> to vector<256x256xf32>
    %15 = vector.shape_cast %12 : vector<256x256xf32> to vector<1x256x256xf32>
    tpu.vector_store %arg5[%c0_14, %c0_15, %c0_16], %15 {strides = array<i32>} : memref<1x256x256xf32, #tpu.memory_space<vmem>>, vector<1x256x256xf32>,
    return
  }
  func.func @transform_0(%arg0: i32, %arg1: i32) -> (i32, i32, i32, i32) {
    %c0_i32 = arith.constant 0 : i32
    %c0_i32_0 = arith.constant 0 : i32
    %c0_i32_1 = arith.constant 0 : i32
    %c0_i32_2 = arith.constant 0 : i32
    return %arg0, %c0_i32, %c0_i32_0, %c0_i32_1 : i32, i32, i32, i32
  }
  func.func @transform_1(%arg0: i32, %arg1: i32) -> (i32, i32, i32, i32) {
    %c0_i32 = arith.constant 0 : i32
    %c0_i32_0 = arith.constant 0 : i32
    %c0_i32_1 = arith.constant 0 : i32
    %c0_i32_2 = arith.constant 0 : i32
    return %c0_i32, %c0_i32_0, %c0_i32_1, %arg1 : i32, i32, i32, i32
  }
  func.func @transform_2(%arg0: i32, %arg1: i32) -> (i32, i32) {
    %c0_i32 = arith.constant 0 : i32
    %c0_i32_0 = arith.constant 0 : i32
    return %c0_i32, %arg1 : i32, i32
  }
  func.func @transform_3(%arg0: i32, %arg1: i32) -> (i32, i32, i32) {
    %c0_i32 = arith.constant 0 : i32
    %c0_i32_0 = arith.constant 0 : i32
    return %arg0, %c0_i32, %arg1 : i32, i32, i32
  }
}

</mosaic_0001>

<bundles_post_ra>
// kernel: aspp_forward.1
= control target key start
LH: loop header
LB: loop body
LE: loop exit
PB: predicated region body
PF: predicated region fallthrough
CT: control target
= control target key end

     0   :  { %8 = vsyncpa [#allocation4], 0  ;;  %s1596_s0 = inlined_call_operand.vmem [shape: bf16[2,16,16,32], index: 0, kind: input, shape index: {}]   ;;  %s1597_s1 = inlined_call_operand.vmem [shape: bf16[1,1,32,256], index: 1, kind: input, shape index: {}]   ;;  %s1598_s2 = inlined_call_operand.vmem [shape: f32[1,256], index: 2, kind: input, shape index: {}]   ;;  %s1599_s3 = inlined_call_operand.hbm [shape: f32[2,256,256], index: 3, kind: output, shape index: {}]  }
   0x1   :  { %10 = vsyncpa [#allocation4 + $0x1], 0  ;;  %s1293_s12 = smov 0   ;;  %s1295_s13 = smov 0  }
   0x2   :  { %s1297_s14 = smov 0   ;;  %s1299_s15 = smov 0  }
   0x3   :  { %s1301_s16 = smov 0   ;;  %s1303_s17 = smov 0  }
   0x4 LB: > { %s1052_s18 = sadd.s32 4294967295, %s1267_s17   ;;  %s1053_s19 = sadd.s32 4294967294, %s1267_s17   ;;  %s1267_s17 = sphi %s1303_s17, %s16_s17   ;;  %s1263_s16 = sphi %s1301_s16, %s1606_s16   ;;  %s1259_s15 = sphi %s1299_s15, %s1605_s15   ;;  %s1255_s14 = sphi %s1297_s14, %s1604_s14   ;;  %s1251_s13 = sphi %s1295_s13, %s1603_s13   ;;  %s1247_s12 = sphi %s1293_s12, %s1602_s12  }
   0x5   : > { %s28_s20 = sadd.s32 1, %s1263_s16  ;;  %s115_s21 = sadd.s32 1, %s1255_s14 }
   0x6   : > { %p30_p0 = scmp.ge.s32.totalorder %s28_s20, 2  ;;  %p125_p1 = scmp.ne.s32.totalorder %s1255_s14, %s1251_s13 }
   0x7   : > { %p126_p2 = scmp.eq.s32.totalorder %s1052_s18, 1  ;;  %p131_p3 = scmp.ne.s32.totalorder %s1251_s13, %s1247_s12 }
   0x8   : > { %s1608_s20 = smov (%p30_p0, %s28_s20), 0  ;;  %p132_p5 = scmp.eq.s32.totalorder %s1053_s19, 1 }
   0x9   : > { %p1333_p4 = por %p126_p2, %p125_p1  ;;  %s110_s23 = ssub.s32 %s1263_s16, %s1608_s20 }
   0xa   : > { %p1058_p6 = scmp.ge.s32.totalorder %s1267_s17, 1  ;;  %p113_p7 = scmp.eq.s32.totalorder %s110_s23, 0 }
   0xb   : > { %p1340_p8 = por %p132_p5, %p131_p3  ;;  %p175_p9 = scmp.lt.s32.totalorder %s1267_s17, 3 }
   0xc   : > { %s1346_s25 = scalar_select %p113_p7, %s1255_s14, %s115_s21  }
   0xd   : > { %p176_p10 = pnand %p1058_p6, %p175_p9 }
   0xe   : > { %v1167_v0 = vld [vmem:[%s1597_s1 + $0x4] ss:$8 sps:$4 sm:$0xff] (!%p176_p10)   ;;  %p208_p11 = scmp.lt.s32.totalorder (!%p176_p10), %s1259_s15, 1  ;;  %v1169_v1 = vld [vmem:[%s1597_s1] ss:$8 sps:$4 sm:$0xff] (!%p176_p10)   ;;  %v1269_v2 = vmov (!%p176_p10), 0   ;;  %v734_v21 = vlaneseq (!%p176_p10) }
   0xf   : > { %179 = sbr.rel (%p176_p10) target bundleno = 318 (0x13e), region = 32  ;;  %444 = vmatprep.mubr.bf16.mxu0 (!%p176_p10), %v1269_v2  ;;  %524 = vmatprep.mubr.bf16.mxu1 (!%p176_p10), %v1269_v2  ;;  %v1170_v3 = vld [vmem:[%s1597_s1 + $0x14] ss:$8 sps:$4 sm:$0xff] (!%p176_p10)   ;;  %v1172_v4 = vld [vmem:[%s1597_s1 + $0x10] ss:$8 sps:$4 sm:$0xff] (!%p176_p10)   ;;  %vm363_vm0 = vcmask (!%p176_p10), 261120  }
  0x10   : > { %412 = vmatprep.subr.bf16.mxu0 (!%p176_p10), %v1167_v0  ;;  %1105 = vmatprep.subr.bf16.mxu1 (!%p176_p10), %v1167_v0  ;;  %v735_v22 = vshrl.u32 (!%p176_p10), %v734_v21, 7  ;;  %v226_v24 = vld [vmem:[%s1598_s2] sm:$0x3] (!%p176_p10)  ;;  %s205_s21 = sand.u32 (!%p176_p10), 1, %s1251_s13   ;;  %s1104_s27 = sshll.u32 (!%p176_p10), %s1259_s15, 13 }
  0x11   : > { %413 = vmatpush1.bf16.msra.mxu0 (!%p176_p10), %v1169_v1  ;;  %1107 = vmatpush1.bf16.msra.mxu1 (!%p176_p10), %v1169_v1  ;;  %s1059_s23 = sshll.u32 (!%p176_p10), %s205_s21, 9  ;;  %s1538_s30 = scalar_lea.hbm (!%p176_p10), %s1599_s3, %s1104_s27 }
  0x12   : > { %414 = vmatprep.subr.bf16.mxu0 (!%p176_p10), %v1170_v3  ;;  %1106 = vmatprep.subr.bf16.mxu1 (!%p176_p10), %v1170_v3  ;;  %v736_v23 = vsub.s32 (!%p176_p10), 0, %v735_v22  ;;  %v740_v25 = vsub.s32 (!%p176_p10), 1, %v735_v22  ;;  %s1417_s26 = scalar_lea.vmem (!%p176_p10), [#allocation3], %s1059_s23  ;;  %s1550_s4 = scalar_lea.sflag (!%p176_p10), [#allocation4], %s205_s21 }
  0x13   : > { %s952_s28 = sshll.u32 (!%p176_p10), %s1417_s26, 4  ;;  %s1270_s6 = smov (!%p176_p10), [#allocation3]   ;;  %s1540_s28 = int_to_ptr.vmem [resolvable:$true] %s952_s28 }
  0x14   : > { %v1403_v26 = vrot.slane (!%p176_p10), %v226_v24, %v736_v23  ;;  %v1405_v27 = vrot.slane (!%p176_p10), %v226_v24, %v740_v25  ;;  %s1193_s7 = sshll.u32 (!%p176_p10), %s1270_s6, 4  ;;  %s1194_s7 = int_to_ptr.vmem [resolvable:$false] %s1193_s7 }
  0x15   : > { %415 = vmatpush1.bf16.msra.mxu0 (!%p176_p10), %v1172_v4  ;;  %1108 = vmatpush1.bf16.msra.mxu1 (!%p176_p10), %v1172_v4  ;;  %p1196_p1 = scmp.lt.s32.totalorder (!%p176_p10), %s1540_s28, %s1194_s7 }
  0x16   : > { %s209_s5 = scalar_select %p208_p11, %s1259_s15, 1 }
  0x18   : > { %s1103_s8 = sshll.u32 %s209_s5, 7  ;;  %s1189_s5 = scalar_lea.vmem %s1540_s28, 8192 }
  0x19   : > { %s1365_s11 = scalar_lea.vmem %s1596_s0, %s1103_s8  ;;  %p1190_p12 = scmp.ne.s32.totalorder %s1540_s28, %s1189_s5 }
  0x1a   : > { %v1173_v5 = vld [vmem:[%s1365_s11] sm:$0xff]   ;;  %v1175_v7 = vld [vmem:[%s1365_s11 + $0x8] sm:$0xff]   ;;  %v1177_v9 = vld [vmem:[%s1365_s11 + $0x10] sm:$0xff]   ;;  %s1195_s8 = scalar_lea.vmem %s1194_s7, 16384 }
  0x1b   : > { %v1174_v6 = vld [vmem:[%s1365_s11 + $0x40] sm:$0xff]   ;;  %1082 = vmatmul.mubr.msk.bf16.vlgmr.msra.gmra.mrb[0].mxu0 %vm363_vm0, %v1173_v5  ;;  %v1176_v8 = vld [vmem:[%s1365_s11 + $0x48] sm:$0xff]   ;;  %v1178_v10 = vld [vmem:[%s1365_s11 + $0x50] sm:$0xff]   ;;  %p1191_p13 = pnand %p1190_p12, %p1333_p4  ;;  %p1197_p2 = scmp.lt.s32.totalorder %s1195_s8, %s1189_s5 }
  0x1c   : > { %1090 = vmatmul.mubr.msk.bf16.vlgmr.msra.gmra.mrb[0].mxu1 %vm363_vm0, %v1174_v6  ;;  %454 = vmatprep.mubr.bf16.mxu0 %v1269_v2  ;;  %v1179_v11 = vld [vmem:[%s1365_s11 + $0x18] sm:$0xff]   ;;  %v1181_v13 = vld [vmem:[%s1365_s11 + $0x20] sm:$0xff]   ;;  %v1183_v15 = vld [vmem:[%s1365_s11 + $0x28] sm:$0xff]  }
  0x1d   : > { %534 = vmatprep.mubr.bf16.mxu1 %v1269_v2  ;;  %v1180_v12 = vld [vmem:[%s1365_s11 + $0x58] sm:$0xff]   ;;  %v1182_v14 = vld [vmem:[%s1365_s11 + $0x60] sm:$0xff]   ;;  %v1184_v16 = vld [vmem:[%s1365_s11 + $0x68] sm:$0xff]   ;;  %p1192_p0 = pneg %p1191_p13  ;;  %p1198_p3 = por %p1197_p2, %p1196_p1 }
  0x1e   : > { %v1185_v17 = vld [vmem:[%s1365_s11 + $0x30] sm:$0xff]   ;;  %v1187_v19 = vld [vmem:[%s1365_s11 + $0x38] sm:$0xff]  }
  0x1f   : > { %v1186_v18 = vld [vmem:[%s1365_s11 + $0x70] sm:$0xff]   ;;  %v1188_v20 = vld [vmem:[%s1365_s11 + $0x78] sm:$0xff]   ;;  %p1199_p5 = pnand %p1198_p3, %p1192_p0 }
  0x23   : > { %1083 = vmatmul.mubr.msk.bf16.gmra.mrb[4].mxu0 %vm363_vm0, %v1175_v7 }
  0x24   : > { %1091 = vmatmul.mubr.msk.bf16.gmra.mrb[4].mxu1 %vm363_vm0, %v1176_v8  ;;  %464 = vmatprep.mubr.bf16.mxu0 %v1269_v2 }
  0x25   : > { %544 = vmatprep.mubr.bf16.mxu1 %v1269_v2 }
  0x2b   : > { %1084 = vmatmul.mubr.msk.bf16.gmra.mrb[8].mxu0 %vm363_vm0, %v1177_v9 }
  0x2c   : > { %1092 = vmatmul.mubr.msk.bf16.gmra.mrb[8].mxu1 %vm363_vm0, %v1178_v10  ;;  %474 = vmatprep.mubr.bf16.mxu0 %v1269_v2 }
  0x2d   : > { %554 = vmatprep.mubr.bf16.mxu1 %v1269_v2 }
  0x33   : > { %1085 = vmatmul.mubr.msk.bf16.gmra.mrb[12].mxu0 %vm363_vm0, %v1179_v11 }
  0x34   : > { %1093 = vmatmul.mubr.msk.bf16.gmra.mrb[12].mxu1 %vm363_vm0, %v1180_v12  ;;  %484 = vmatprep.mubr.bf16.mxu0 %v1269_v2 }
  0x35   : > { %564 = vmatprep.mubr.bf16.mxu1 %v1269_v2 }
  0x3b   : > { %1086 = vmatmul.mubr.msk.bf16.gmra.mrb[16].mxu0 %vm363_vm0, %v1181_v13 }
  0x3c   : > { %1094 = vmatmul.mubr.msk.bf16.gmra.mrb[16].mxu1 %vm363_vm0, %v1182_v14  ;;  %494 = vmatprep.mubr.bf16.mxu0 %v1269_v2 }
  0x3d   : > { %574 = vmatprep.mubr.bf16.mxu1 %v1269_v2 }
  0x43   : > { %1087 = vmatmul.mubr.msk.bf16.gmra.mrb[20].mxu0 %vm363_vm0, %v1183_v15 }
  0x44   : > { %1095 = vmatmul.mubr.msk.bf16.gmra.mrb[20].mxu1 %vm363_vm0, %v1184_v16  ;;  %504 = vmatprep.mubr.bf16.mxu0 %v1269_v2 }
  0x45   : > { %584 = vmatprep.mubr.bf16.mxu1 %v1269_v2 }
  0x4b   : > { %1088 = vmatmul.mubr.msk.bf16.gmra.mrb[24].mxu0 %vm363_vm0, %v1185_v17 }
  0x4c   : > { %1096 = vmatmul.mubr.msk.bf16.gmra.mrb[24].mxu1 %vm363_vm0, %v1186_v18  ;;  %514 = vmatprep.mubr.bf16.mxu0 %v1269_v2 }
  0x4d   : > { %594 = vmatprep.mubr.bf16.mxu1 %v1269_v2 }
  0x53   : > { %1089 = vmatmul.mubr.msk.bf16.gmra.mrb[28].mxu0 %vm363_vm0, %v1187_v19 }
  0x54   : > { %1097 = vmatmul.mubr.msk.bf16.gmra.mrb[28].mxu1 %vm363_vm0, %v1188_v20 }
  0xee   : > { %v446_v28 = vpop.f32.mrb[0].mxu0 }
  0xef   : > { %v526_v29 = vpop.f32.mrb[0].mxu1  ;;  %v744_v30 = vadd.f32 %v1403_v26, %v446_v28  ;;  %v448_v32 = vpop.f32.mrb[1].mxu0 }
  0xf0   : > { %v776_v31 = vadd.f32 %v1403_v26, %v526_v29  ;;  %v528_v33 = vpop.f32.mrb[1].mxu1  ;;  %v745_v34 = vadd.f32 %v1405_v27, %v448_v32  ;;  %v450_v36 = vpop.f32.mrb[2].mxu0 }
  0xf1   : > { %v777_v35 = vadd.f32 %v1405_v27, %v528_v33  ;;  %v530_v37 = vpop.f32.mrb[2].mxu1  ;;  %v808_v38 = vmax.f32 %v744_v30, 0.0  ;;  %v746_v40 = vadd.f32 %v1403_v26, %v450_v36  ;;  %v452_v42 = vpop.f32.mrb[3].mxu0 }
  0xf2   : > { %v840_v39 = vmax.f32 %v776_v31, 0.0  ;;  %v778_v41 = vadd.f32 %v1403_v26, %v530_v37  ;;  %v532_v43 = vpop.f32.mrb[3].mxu1  ;;  %v809_v44 = vmax.f32 %v745_v34, 0.0  ;;  %v747_v46 = vadd.f32 %v1405_v27, %v452_v42 }
  0xf3   : > { %v841_v45 = vmax.f32 %v777_v35, 0.0  ;;  %v779_v47 = vadd.f32 %v1405_v27, %v532_v43  ;;  %872 = vst [vmem:[%s1417_s26] sm:$0xff] %v808_v38  ;;  %v810_v48 = vmax.f32 %v746_v40, 0.0 }
  0xf4   : > { %904 = vst [vmem:[%s1417_s26 + $0x100] sm:$0xff] %v840_v39  ;;  %v842_v49 = vmax.f32 %v778_v41, 0.0  ;;  %873 = vst [vmem:[%s1417_s26 + $0x8] sm:$0xff] %v809_v44  ;;  %v811_v50 = vmax.f32 %v747_v46, 0.0 }
  0xf5   : > { %905 = vst [vmem:[%s1417_s26 + $0x108] sm:$0xff] %v841_v45  ;;  %v843_v51 = vmax.f32 %v779_v47, 0.0  ;;  %874 = vst [vmem:[%s1417_s26 + $0x10] sm:$0xff] %v810_v48 }
  0xf6   : > { %906 = vst [vmem:[%s1417_s26 + $0x110] sm:$0xff] %v842_v49  ;;  %875 = vst [vmem:[%s1417_s26 + $0x18] sm:$0xff] %v811_v50  ;;  %v456_v52 = vpop.f32.mrb[4].mxu0 }
  0xf7   : > { %907 = vst [vmem:[%s1417_s26 + $0x118] sm:$0xff] %v843_v51  ;;  %v536_v53 = vpop.f32.mrb[4].mxu1  ;;  %v748_v54 = vadd.f32 %v1403_v26, %v456_v52  ;;  %v458_v56 = vpop.f32.mrb[5].mxu0 }
  0xf8   : > { %v780_v55 = vadd.f32 %v1403_v26, %v536_v53  ;;  %v538_v57 = vpop.f32.mrb[5].mxu1  ;;  %v749_v58 = vadd.f32 %v1405_v27, %v458_v56  ;;  %v460_v60 = vpop.f32.mrb[6].mxu0 }
  0xf9   : > { %v781_v59 = vadd.f32 %v1405_v27, %v538_v57  ;;  %v540_v61 = vpop.f32.mrb[6].mxu1  ;;  %v812_v62 = vmax.f32 %v748_v54, 0.0  ;;  %v750_v0 = vadd.f32 %v1403_v26, %v460_v60  ;;  %v462_v2 = vpop.f32.mrb[7].mxu0 }
  0xfa   : > { %v844_v63 = vmax.f32 %v780_v55, 0.0  ;;  %v782_v1 = vadd.f32 %v1403_v26, %v540_v61  ;;  %v542_v3 = vpop.f32.mrb[7].mxu1  ;;  %v813_v4 = vmax.f32 %v749_v58, 0.0  ;;  %v751_v6 = vadd.f32 %v1405_v27, %v462_v2 }
  0xfb   : > { %v845_v5 = vmax.f32 %v781_v59, 0.0  ;;  %v783_v7 = vadd.f32 %v1405_v27, %v542_v3  ;;  %876 = vst [vmem:[%s1417_s26 + $0x20] sm:$0xff] %v812_v62  ;;  %v814_v8 = vmax.f32 %v750_v0, 0.0 }
  0xfc   : > { %908 = vst [vmem:[%s1417_s26 + $0x120] sm:$0xff] %v844_v63  ;;  %v846_v9 = vmax.f32 %v782_v1, 0.0  ;;  %877 = vst [vmem:[%s1417_s26 + $0x28] sm:$0xff] %v813_v4  ;;  %v815_v10 = vmax.f32 %v751_v6, 0.0 }
  0xfd   : > { %909 = vst [vmem:[%s1417_s26 + $0x128] sm:$0xff] %v845_v5  ;;  %v847_v11 = vmax.f32 %v783_v7, 0.0  ;;  %878 = vst [vmem:[%s1417_s26 + $0x30] sm:$0xff] %v814_v8 }
  0xfe   : > { %910 = vst [vmem:[%s1417_s26 + $0x130] sm:$0xff] %v846_v9  ;;  %879 = vst [vmem:[%s1417_s26 + $0x38] sm:$0xff] %v815_v10  ;;  %v466_v12 = vpop.f32.mrb[8].mxu0 }
  0xff   : > { %911 = vst [vmem:[%s1417_s26 + $0x138] sm:$0xff] %v847_v11  ;;  %v546_v13 = vpop.f32.mrb[8].mxu1  ;;  %v752_v14 = vadd.f32 %v1403_v26, %v466_v12  ;;  %v468_v16 = vpop.f32.mrb[9].mxu0 }
 0x100   : > { %v784_v15 = vadd.f32 %v1403_v26, %v546_v13  ;;  %v548_v17 = vpop.f32.mrb[9].mxu1  ;;  %v753_v18 = vadd.f32 %v1405_v27, %v468_v16  ;;  %v470_v20 = vpop.f32.mrb[10].mxu0 }
 0x101   : > { %v785_v19 = vadd.f32 %v1405_v27, %v548_v17  ;;  %v550_v21 = vpop.f32.mrb[10].mxu1  ;;  %v816_v22 = vmax.f32 %v752_v14, 0.0  ;;  %v754_v24 = vadd.f32 %v1403_v26, %v470_v20  ;;  %v472_v28 = vpop.f32.mrb[11].mxu0 }
 0x102   : > { %v848_v23 = vmax.f32 %v784_v15, 0.0  ;;  %v786_v25 = vadd.f32 %v1403_v26, %v550_v21  ;;  %v552_v29 = vpop.f32.mrb[11].mxu1  ;;  %v817_v30 = vmax.f32 %v753_v18, 0.0  ;;  %v755_v32 = vadd.f32 %v1405_v27, %v472_v28 }
 0x103   : > { %v849_v31 = vmax.f32 %v785_v19, 0.0  ;;  %v787_v33 = vadd.f32 %v1405_v27, %v552_v29  ;;  %880 = vst [vmem:[%s1417_s26 + $0x40] sm:$0xff] %v816_v22  ;;  %v818_v34 = vmax.f32 %v754_v24, 0.0 }
 0x104   : > { %912 = vst [vmem:[%s1417_s26 + $0x140] sm:$0xff] %v848_v23  ;;  %v850_v35 = vmax.f32 %v786_v25, 0.0  ;;  %881 = vst [vmem:[%s1417_s26 + $0x48] sm:$0xff] %v817_v30  ;;  %v819_v36 = vmax.f32 %v755_v32, 0.0 }
 0x105   : > { %913 = vst [vmem:[%s1417_s26 + $0x148] sm:$0xff] %v849_v31  ;;  %v851_v37 = vmax.f32 %v787_v33, 0.0  ;;  %882 = vst [vmem:[%s1417_s26 + $0x50] sm:$0xff] %v818_v34 }
 0x106   : > { %914 = vst [vmem:[%s1417_s26 + $0x150] sm:$0xff] %v850_v35  ;;  %883 = vst [vmem:[%s1417_s26 + $0x58] sm:$0xff] %v819_v36  ;;  %v476_v38 = vpop.f32.mrb[12].mxu0 }
 0x107   : > { %915 = vst [vmem:[%s1417_s26 + $0x158] sm:$0xff] %v851_v37  ;;  %v556_v39 = vpop.f32.mrb[12].mxu1  ;;  %v756_v40 = vadd.f32 %v1403_v26, %v476_v38  ;;  %v478_v42 = vpop.f32.mrb[13].mxu0 }
 0x108   : > { %v788_v41 = vadd.f32 %v1403_v26, %v556_v39  ;;  %v558_v43 = vpop.f32.mrb[13].mxu1  ;;  %v757_v44 = vadd.f32 %v1405_v27, %v478_v42  ;;  %v480_v46 = vpop.f32.mrb[14].mxu0 }
 0x109   : > { %v789_v45 = vadd.f32 %v1405_v27, %v558_v43  ;;  %v560_v47 = vpop.f32.mrb[14].mxu1  ;;  %v820_v48 = vmax.f32 %v756_v40, 0.0  ;;  %v758_v50 = vadd.f32 %v1403_v26, %v480_v46  ;;  %v482_v52 = vpop.f32.mrb[15].mxu0 }
 0x10a   : > { %v852_v49 = vmax.f32 %v788_v41, 0.0  ;;  %v790_v51 = vadd.f32 %v1403_v26, %v560_v47  ;;  %v562_v53 = vpop.f32.mrb[15].mxu1  ;;  %v821_v54 = vmax.f32 %v757_v44, 0.0  ;;  %v759_v56 = vadd.f32 %v1405_v27, %v482_v52 }
 0x10b   : > { %v853_v55 = vmax.f32 %v789_v45, 0.0  ;;  %v791_v57 = vadd.f32 %v1405_v27, %v562_v53  ;;  %884 = vst [vmem:[%s1417_s26 + $0x60] sm:$0xff] %v820_v48  ;;  %v822_v58 = vmax.f32 %v758_v50, 0.0 }
 0x10c   : > { %916 = vst [vmem:[%s1417_s26 + $0x160] sm:$0xff] %v852_v49  ;;  %v854_v59 = vmax.f32 %v790_v51, 0.0  ;;  %885 = vst [vmem:[%s1417_s26 + $0x68] sm:$0xff] %v821_v54  ;;  %v823_v60 = vmax.f32 %v759_v56, 0.0 }
 0x10d   : > { %917 = vst [vmem:[%s1417_s26 + $0x168] sm:$0xff] %v853_v55  ;;  %v855_v61 = vmax.f32 %v791_v57, 0.0  ;;  %886 = vst [vmem:[%s1417_s26 + $0x70] sm:$0xff] %v822_v58 }
 0x10e   : > { %918 = vst [vmem:[%s1417_s26 + $0x170] sm:$0xff] %v854_v59  ;;  %887 = vst [vmem:[%s1417_s26 + $0x78] sm:$0xff] %v823_v60  ;;  %v486_v62 = vpop.f32.mrb[16].mxu0 }
 0x10f   : > { %919 = vst [vmem:[%s1417_s26 + $0x178] sm:$0xff] %v855_v61  ;;  %v566_v63 = vpop.f32.mrb[16].mxu1  ;;  %v760_v0 = vadd.f32 %v1403_v26, %v486_v62  ;;  %v488_v2 = vpop.f32.mrb[17].mxu0 }
 0x110   : > { %v792_v1 = vadd.f32 %v1403_v26, %v566_v63  ;;  %v568_v3 = vpop.f32.mrb[17].mxu1  ;;  %v761_v4 = vadd.f32 %v1405_v27, %v488_v2  ;;  %v490_v6 = vpop.f32.mrb[18].mxu0 }
 0x111   : > { %v793_v5 = vadd.f32 %v1405_v27, %v568_v3  ;;  %v570_v7 = vpop.f32.mrb[18].mxu1  ;;  %v824_v8 = vmax.f32 %v760_v0, 0.0  ;;  %v762_v10 = vadd.f32 %v1403_v26, %v490_v6  ;;  %v492_v12 = vpop.f32.mrb[19].mxu0 }
 0x112   : > { %v856_v9 = vmax.f32 %v792_v1, 0.0  ;;  %v794_v11 = vadd.f32 %v1403_v26, %v570_v7  ;;  %v572_v13 = vpop.f32.mrb[19].mxu1  ;;  %v825_v14 = vmax.f32 %v761_v4, 0.0  ;;  %v763_v16 = vadd.f32 %v1405_v27, %v492_v12 }
 0x113   : > { %v857_v15 = vmax.f32 %v793_v5, 0.0  ;;  %v795_v17 = vadd.f32 %v1405_v27, %v572_v13  ;;  %888 = vst [vmem:[%s1417_s26 + $0x80] sm:$0xff] %v824_v8  ;;  %v826_v18 = vmax.f32 %v762_v10, 0.0 }
 0x114   : > { %920 = vst [vmem:[%s1417_s26 + $0x180] sm:$0xff] %v856_v9  ;;  %v858_v19 = vmax.f32 %v794_v11, 0.0  ;;  %889 = vst [vmem:[%s1417_s26 + $0x88] sm:$0xff] %v825_v14  ;;  %v827_v20 = vmax.f32 %v763_v16, 0.0 }
 0x115   : > { %921 = vst [vmem:[%s1417_s26 + $0x188] sm:$0xff] %v857_v15  ;;  %v859_v21 = vmax.f32 %v795_v17, 0.0  ;;  %890 = vst [vmem:[%s1417_s26 + $0x90] sm:$0xff] %v826_v18 }
 0x116   : > { %922 = vst [vmem:[%s1417_s26 + $0x190] sm:$0xff] %v858_v19  ;;  %891 = vst [vmem:[%s1417_s26 + $0x98] sm:$0xff] %v827_v20  ;;  %v496_v22 = vpop.f32.mrb[20].mxu0 }
 0x117   : > { %923 = vst [vmem:[%s1417_s26 + $0x198] sm:$0xff] %v859_v21  ;;  %v576_v23 = vpop.f32.mrb[20].mxu1  ;;  %v764_v24 = vadd.f32 %v1403_v26, %v496_v22  ;;  %v498_v28 = vpop.f32.mrb[21].mxu0 }
 0x118   : > { %v796_v25 = vadd.f32 %v1403_v26, %v576_v23  ;;  %v578_v29 = vpop.f32.mrb[21].mxu1  ;;  %v765_v30 = vadd.f32 %v1405_v27, %v498_v28  ;;  %v500_v32 = vpop.f32.mrb[22].mxu0 }
 0x119   : > { %v797_v31 = vadd.f32 %v1405_v27, %v578_v29  ;;  %v580_v33 = vpop.f32.mrb[22].mxu1  ;;  %v828_v34 = vmax.f32 %v764_v24, 0.0  ;;  %v766_v36 = vadd.f32 %v1403_v26, %v500_v32  ;;  %v502_v38 = vpop.f32.mrb[23].mxu0 }
 0x11a   : > { %v860_v35 = vmax.f32 %v796_v25, 0.0  ;;  %v798_v37 = vadd.f32 %v1403_v26, %v580_v33  ;;  %v582_v39 = vpop.f32.mrb[23].mxu1  ;;  %v829_v40 = vmax.f32 %v765_v30, 0.0  ;;  %v767_v42 = vadd.f32 %v1405_v27, %v502_v38 }
 0x11b   : > { %v861_v41 = vmax.f32 %v797_v31, 0.0  ;;  %v799_v43 = vadd.f32 %v1405_v27, %v582_v39  ;;  %892 = vst [vmem:[%s1417_s26 + $0xa0] sm:$0xff] %v828_v34  ;;  %v830_v44 = vmax.f32 %v766_v36, 0.0 }
 0x11c   : > { %924 = vst [vmem:[%s1417_s26 + $0x1a0] sm:$0xff] %v860_v35  ;;  %v862_v45 = vmax.f32 %v798_v37, 0.0  ;;  %893 = vst [vmem:[%s1417_s26 + $0xa8] sm:$0xff] %v829_v40  ;;  %v831_v46 = vmax.f32 %v767_v42, 0.0 }
 0x11d   : > { %925 = vst [vmem:[%s1417_s26 + $0x1a8] sm:$0xff] %v861_v41  ;;  %v863_v47 = vmax.f32 %v799_v43, 0.0  ;;  %894 = vst [vmem:[%s1417_s26 + $0xb0] sm:$0xff] %v830_v44 }
 0x11e   : > { %926 = vst [vmem:[%s1417_s26 + $0x1b0] sm:$0xff] %v862_v45  ;;  %895 = vst [vmem:[%s1417_s26 + $0xb8] sm:$0xff] %v831_v46  ;;  %v506_v48 = vpop.f32.mrb[24].mxu0 }
 0x11f   : > { %927 = vst [vmem:[%s1417_s26 + $0x1b8] sm:$0xff] %v863_v47  ;;  %v586_v49 = vpop.f32.mrb[24].mxu1  ;;  %v768_v50 = vadd.f32 %v1403_v26, %v506_v48  ;;  %v508_v52 = vpop.f32.mrb[25].mxu0 }
 0x120   : > { %v800_v51 = vadd.f32 %v1403_v26, %v586_v49  ;;  %v588_v53 = vpop.f32.mrb[25].mxu1  ;;  %v769_v54 = vadd.f32 %v1405_v27, %v508_v52  ;;  %v510_v56 = vpop.f32.mrb[26].mxu0 }
 0x121   : > { %v801_v55 = vadd.f32 %v1405_v27, %v588_v53  ;;  %v590_v57 = vpop.f32.mrb[26].mxu1  ;;  %v832_v58 = vmax.f32 %v768_v50, 0.0  ;;  %v770_v60 = vadd.f32 %v1403_v26, %v510_v56  ;;  %v512_v62 = vpop.f32.mrb[27].mxu0 }
 0x122   : > { %v864_v59 = vmax.f32 %v800_v51, 0.0  ;;  %v802_v61 = vadd.f32 %v1403_v26, %v590_v57  ;;  %v592_v63 = vpop.f32.mrb[27].mxu1  ;;  %v833_v0 = vmax.f32 %v769_v54, 0.0  ;;  %v771_v2 = vadd.f32 %v1405_v27, %v512_v62 }
 0x123   : > { %v865_v1 = vmax.f32 %v801_v55, 0.0  ;;  %v803_v3 = vadd.f32 %v1405_v27, %v592_v63  ;;  %896 = vst [vmem:[%s1417_s26 + $0xc0] sm:$0xff] %v832_v58  ;;  %v834_v4 = vmax.f32 %v770_v60, 0.0 }
 0x124   : > { %928 = vst [vmem:[%s1417_s26 + $0x1c0] sm:$0xff] %v864_v59  ;;  %v866_v5 = vmax.f32 %v802_v61, 0.0  ;;  %897 = vst [vmem:[%s1417_s26 + $0xc8] sm:$0xff] %v833_v0  ;;  %v835_v6 = vmax.f32 %v771_v2, 0.0 }
 0x125   : > { %929 = vst [vmem:[%s1417_s26 + $0x1c8] sm:$0xff] %v865_v1  ;;  %v867_v7 = vmax.f32 %v803_v3, 0.0  ;;  %898 = vst [vmem:[%s1417_s26 + $0xd0] sm:$0xff] %v834_v4 }
 0x126   : > { %930 = vst [vmem:[%s1417_s26 + $0x1d0] sm:$0xff] %v866_v5  ;;  %899 = vst [vmem:[%s1417_s26 + $0xd8] sm:$0xff] %v835_v6  ;;  %v516_v8 = vpop.f32.mrb[28].mxu0 }
 0x127   : > { %931 = vst [vmem:[%s1417_s26 + $0x1d8] sm:$0xff] %v867_v7  ;;  %v596_v9 = vpop.f32.mrb[28].mxu1  ;;  %v772_v10 = vadd.f32 %v1403_v26, %v516_v8  ;;  %v518_v12 = vpop.f32.mrb[29].mxu0 }
 0x128   : > { %v804_v11 = vadd.f32 %v1403_v26, %v596_v9  ;;  %v598_v13 = vpop.f32.mrb[29].mxu1  ;;  %v773_v14 = vadd.f32 %v1405_v27, %v518_v12  ;;  %v520_v16 = vpop.f32.mrb[30].mxu0 }
 0x129   : > { %v805_v15 = vadd.f32 %v1405_v27, %v598_v13  ;;  %v600_v17 = vpop.f32.mrb[30].mxu1  ;;  %v836_v18 = vmax.f32 %v772_v10, 0.0  ;;  %v774_v20 = vadd.f32 %v1403_v26, %v520_v16  ;;  %v522_v22 = vpop.f32.mrb[31].mxu0 }
 0x12a   : > { %v868_v19 = vmax.f32 %v804_v11, 0.0  ;;  %v806_v21 = vadd.f32 %v1403_v26, %v600_v17  ;;  %v602_v23 = vpop.f32.mrb[31].mxu1  ;;  %v837_v24 = vmax.f32 %v773_v14, 0.0  ;;  %v775_v28 = vadd.f32 %v1405_v27, %v522_v22 }
 0x12b   : > { %v869_v25 = vmax.f32 %v805_v15, 0.0  ;;  %v807_v29 = vadd.f32 %v1405_v27, %v602_v23  ;;  %900 = vst [vmem:[%s1417_s26 + $0xe0] sm:$0xff] %v836_v18  ;;  %v838_v30 = vmax.f32 %v774_v20, 0.0 }
 0x12c   : > { %932 = vst [vmem:[%s1417_s26 + $0x1e0] sm:$0xff] %v868_v19  ;;  %v870_v31 = vmax.f32 %v806_v21, 0.0  ;;  %901 = vst [vmem:[%s1417_s26 + $0xe8] sm:$0xff] %v837_v24  ;;  %v839_v26 = vmax.f32 %v775_v28, 0.0 }
 0x12d   : > { %933 = vst [vmem:[%s1417_s26 + $0x1e8] sm:$0xff] %v869_v25  ;;  %v871_v32 = vmax.f32 %v807_v29, 0.0  ;;  %902 = vst [vmem:[%s1417_s26 + $0xf0] sm:$0xff] %v838_v30 }
 0x12e   : > { %934 = vst [vmem:[%s1417_s26 + $0x1f0] sm:$0xff] %v870_v31  ;;  %903 = vst [vmem:[%s1417_s26 + $0xf8] sm:$0xff] %v839_v26 }
 0x12f   : > { %935 = vst [vmem:[%s1417_s26 + $0x1f8] sm:$0xff] %v871_v32 }
 0x130   : > { %1202 = shalt.err (!%p1199_p5)
}
 0x131   : > { %s1203_s9 = scalar_lea.hbm %s1538_s30, 8192  ;;  %s1207_s18 = scalar_lea.hbm %s1599_s3, 16384 }
 0x132   : > { %p1204_p6 = scmp.ne.s32.totalorder %s1538_s30, %s1203_s9  ;;  %p1208_p10 = scmp.lt.u32.totalorder %s1538_s30, %s1599_s3 }
 0x133   : > { %p1209_p11 = scmp.lt.u32.totalorder %s1207_s18, %s1203_s9  ;;  %p1211_p13 = scmp.lt.u32.totalorder %s1203_s9, %s1538_s30 }
 0x134   : > { %p1205_p7 = pnand %p1204_p6, %p1333_p4 }
 0x135   : > { %p1210_p12 = por %p1209_p11, %p1208_p10 }
 0x136   : > { %p1206_p9 = pneg %p1205_p7 }
 0x137   : > { %p1212_p0 = por %p1211_p13, %p1210_p12 }
 0x139   : > { %p1213_p1 = pnand %p1212_p0, %p1206_p9 }
 0x13b   : > { %1216 = shalt.err (!%p1213_p1)
}
 0x13c   : > { %s1271_s23 = smov 256   ;;  %s1272_s26 = smov 16  }
 0x13d   : > { %1109 = dma.vmem_to_hbm [thread:$0]  (%p1333_p4), %s1540_s28, 8192, %s1538_s30, %s1550_s4, %s1271_s23, %s1271_s23, %s1272_s26  }
 0x13e PF: > { %p1115_p2 = scmp.ge.s32.totalorder %s1267_s17, 2  ;;  %s967_s27 = sand.u32 1, %s1247_s12  }
 0x13f   : > { %s968_s15 = scalar_lea.sflag [#allocation4], %s967_s27 }
 0x140   : > { %p1112_p3 = pnand %p1115_p2, %p1340_p8 }
 0x142   : > { %1242 = dma.done.wait (!%p1112_p3), %s968_s15, 8192  }
 0x143   : > { %1244 = vsyncadd (!%p1112_p3), %s968_s15, 4294959104  ;;  %s16_s17 = sadd.s32 1, %s1267_s17   ;;  %s1602_s12 = smov %s1251_s13 }
 0x144   : > { %p13_p5 = scmp.ge.s32.totalorder %s16_s17, 4   ;;  %s1603_s13 = smov %s1255_s14 }
 0x145   : > { %s1604_s14 = smov %s1346_s25  ;;  %s1605_s15 = smov %s1263_s16 }
 0x146   : > { %s1606_s16 = smov %s1608_s20  ;;  %15 = sbr.rel (!%p13_p5) target bundleno = 4 (0x4), region = 73 }
 0x14d   :  { %973 = vsyncpa [#allocation4], 1 }
 0x14e   :  { %975 = vsyncpa [#allocation4 + $0x1], 1 }

</bundles_post_ra>
